<compile_context>
chip_gen: v7x
topology: tpu7x:2x2x1
jax: 0.10.0
libtpu: 0.0.40
codegen_flags: <defaults>
</compile_context>

<pallas_src>
import functools
import math
from typing import NamedTuple

import jax
import jax.numpy as jnp
from jax.experimental import pallas as pl
from jax.experimental.pallas import tpu as pltpu

_NEG_LARGE = -1e30  # finite "-inf": exp(-1e30 - m) underflows to exactly 0 in f32


def _round_up(x, m):
    return ((x + m - 1) // m) * m


@functools.lru_cache(maxsize=1)
def _tpu_defaults():
    """(tile_rows, tile_vocab, vmem_limit_bytes) for the current TPU generation."""
    kind = ""
    try:
        kind = jax.devices()[0].device_kind.lower()
    except Exception:
        pass
    is_v5e = ("v5e" in kind) or ("v5 lite" in kind) or ("v5litepod" in kind)
    is_v7 = "v7" in kind
    vmem_cap = 64 * 1024 * 1024 if is_v7 else 128 * 1024 * 1024
    try:
        info_vmem = int(pltpu.get_tpu_info().vmem_capacity_bytes)
        if info_vmem > 0:
            vmem_cap = min(vmem_cap, info_vmem)
    except Exception:
        pass
    tile_rows = 128 if is_v5e else 256
    tile_vocab = 1024 if (not is_v5e and vmem_cap > 80 * 1024 * 1024) else 512
    # Leave headroom for compiler-internal scratch; never ask for >100 MiB.
    vmem_limit = max(32 * 1024 * 1024,
                     min(vmem_cap - 12 * 1024 * 1024, 100 * 1024 * 1024))
    return tile_rows, tile_vocab, vmem_limit


class GeneratorParams(NamedTuple):
    w_p: jax.Array      # (d_model, v_p) compute dtype, pre-transposed + padded
    b_p: jax.Array      # (1, v_p) f32, padded columns = _NEG_LARGE
    vocab: int          # true vocab size
    tile_vocab: int     # tv; divides v_p


def prepare_generator_params(weight, bias, *, tile_vocab=None,
                             compute_dtype=jnp.bfloat16):
    """One-time prep of nn.Linear(d_model, vocab) parameters.

    weight : (vocab, d_model)  -- PyTorch nn.Linear layout
    bias   : (vocab,)
    The weight is transposed to (d_model, vocab), padded to a vocab-tile
    multiple and cast to the compute dtype ONCE, so the per-step forward does
    no weight-sized HBM copies.
    """
    vocab, d_model = weight.shape
    if tile_vocab is None:
        _, tile_vocab, _ = _tpu_defaults()
    tv = min(_round_up(int(tile_vocab), 128), _round_up(vocab, 128))
    v_p = _round_up(vocab, tv)
    cd = jnp.dtype(compute_dtype)
    w_p = jnp.zeros((d_model, v_p), cd).at[:, :vocab].set(weight.T.astype(cd))
    b_p = jnp.full((1, v_p), _NEG_LARGE, jnp.float32).at[:, :vocab].set(
        bias.astype(jnp.float32)[None, :])
    return GeneratorParams(w_p=w_p, b_p=b_p, vocab=int(vocab), tile_vocab=int(tv))


# ----------------------------------------------------------------------------
# Kernel 1: per-tile unnormalized logits + online log-sum-exp over vocab tiles
# ----------------------------------------------------------------------------
def _logits_lse_kernel(x_ref, w_ref, b_ref, logits_ref, lse_ref, m_sc, s_sc, *,
                       row_axis, vocab_axis, per_row_state):
    # x_ref:      (tm, D)        compute dtype (bf16)
    # w_ref:      (D, tv)        compute dtype
    # b_ref:      (1, tv)        f32
    # logits_ref: (tm, tv)       f32 -- unnormalized logits for this tile
    # lse_ref:    (tm, 128)      f32 -- final LSE, lane-broadcast (lane-dense store)
    # m_sc/s_sc:  (n_state, tm, 1) f32 online-softmax running max / running sum
    j = pl.program_id(vocab_axis)
    nv = pl.num_programs(vocab_axis)
    tm = x_ref.shape[0]
    si = pl.program_id(row_axis) if per_row_state else 0

    @pl.when(j == 0)
    def _init():
        m_sc[si] = jnp.full((tm, 1), _NEG_LARGE, jnp.float32)
        s_sc[si] = jnp.zeros((tm, 1), jnp.float32)

    # MXU matmul with f32 accumulation; bias add + softmax math in f32.
    logits = jnp.dot(x_ref[...], w_ref[...],
                     preferred_element_type=jnp.float32) + b_ref[...]
    logits_ref[...] = logits          # raw logits straight to the tile output

    # Online log-sum-exp update over the vocab tiles.
    m_prev = m_sc[si]
    m_new = jnp.maximum(m_prev, jnp.max(logits, axis=-1, keepdims=True))
    s_new = (s_sc[si] * jnp.exp(m_prev - m_new)
             + jnp.sum(jnp.exp(logits - m_new), axis=-1, keepdims=True))
    m_sc[si] = m_new
    s_sc[si] = s_new

    @pl.when(j == nv - 1)
    def _finalize():
        lse = m_new + jnp.log(s_new)                       # (tm, 1)
        lse_ref[...] = jnp.broadcast_to(lse, lse_ref.shape)


# ----------------------------------------------------------------------------
# Kernel 2: normalize -- log_probs = logits - lse  (single lane-dense subtract)
# ----------------------------------------------------------------------------
def _normalize_kernel(logits_ref, lse_ref, o_ref):
    o_ref[...] = logits_ref[...] - lse_ref[:, 0:1]


def generator_forward(x, params: GeneratorParams, *, tile_rows=None):
    """log_softmax(x @ W.T + b, axis=-1) with pre-prepared params.

    x : (..., d_model) float -> (..., vocab) float32 log-probabilities.
    """
    w_p, b_p, vocab, tv = params.w_p, params.b_p, params.vocab, params.tile_vocab
    cd = jnp.dtype(w_p.dtype)
    cd_bytes = cd.itemsize
    d_model = x.shape[-1]
    assert w_p.shape[0] == d_model, "weight/input d_model mismatch"
    v_p = w_p.shape[1]
    nv = v_p // tv

    lead = x.shape[:-1]
    rows = int(math.prod(lead)) if lead else 1

    def_rows, _, vmem_limit = _tpu_defaults()
    if tile_rows is None:
        tile_rows = def_rows

    # Row tile: multiple of 16 for bf16 sublane packing (8 for f32, 32 for 8-bit),
    # never larger than the problem so tiny/decode inputs don't over-pad.
    sub = max(8, 32 // cd_bytes)
    tm = _round_up(min(int(tile_rows), _round_up(rows, sub)), sub)

    def vmem_est(tm_, n_state):
        return (2 * tm_ * d_model * cd_bytes      # x   (double-buffered)
                + 2 * d_model * tv * cd_bytes     # w   (double-buffered)
                + 2 * 8 * tv * 4                  # bias (sublane-padded)
                + 2 * tm_ * tv * 4                # logits tile out
                + 2 * tm_ * 128 * 4               # lse out
                + 2 * n_state * tm_ * 128 * 4)    # m/s scratch (lane-padded)

    while vmem_est(tm, 1) > vmem_limit and tm > sub:
        tm = max(sub, _round_up(tm // 2, sub))

    rows_p = _round_up(rows, tm)
    nr = rows_p // tm

    # --- pad activations only (weight/bias were prepared once) --------------
    x2d = x.reshape(rows, d_model).astype(cd)
    x_p = jnp.pad(x2d, ((0, rows_p - rows), (0, 0)))

    # --- grid order: minimize HBM re-streaming --------------------------------
    # rows-outer re-streams the weight nr times; vocab-outer re-streams x nv
    # times but keeps online-LSE state per row tile.  Pick the cheaper one
    # (vocab-outer only when the per-row-tile state stays small).
    total_a = rows_p * d_model + nr * d_model * v_p      # rows outer, vocab inner
    total_b = d_model * v_p + nv * rows_p * d_model      # vocab outer, rows inner
    use_vocab_outer = (nr > 1 and nr <= 8 and total_b < total_a
                       and vmem_est(tm, nr) <= vmem_limit)

    if use_vocab_outer:
        grid = (nv, nr)
        row_axis, vocab_axis, n_state = 1, 0, nr
        dims = ("arbitrary", "arbitrary")
        x_map = lambda j, i: (i, 0)
        w_map = lambda j, i: (0, j)
        b_map = lambda j, i: (0, j)
        lg_map = lambda j, i: (i, j)
        ls_map = lambda j, i: (i, 0)
        in_bytes = (d_model * v_p * cd_bytes + nv * rows_p * d_model * cd_bytes
                    + 8 * v_p * 4)
    else:
        grid = (nr, nv)
        row_axis, vocab_axis, n_state = 0, 1, 1
        dims = ("parallel", "arbitrary")
        x_map = lambda i, j: (i, 0)
        w_map = lambda i, j: (0, j)
        b_map = lambda i, j: (0, j)
        lg_map = lambda i, j: (i, j)
        ls_map = lambda i, j: (i, 0)
        in_bytes = (rows_p * d_model * cd_bytes + nr * d_model * v_p * cd_bytes
                    + nr * 8 * v_p * 4)

    kernel1 = functools.partial(_logits_lse_kernel, row_axis=row_axis,
                                vocab_axis=vocab_axis,
                                per_row_state=use_vocab_outer)

    cost1 = pl.CostEstimate(
        flops=2 * rows_p * d_model * v_p,
        transcendentals=rows_p * v_p,                     # exp in the online LSE
        bytes_accessed=in_bytes + rows_p * v_p * 4 + rows_p * 128 * 4)

    logits_u, lse = pl.pallas_call(
        kernel1,
        out_shape=(jax.ShapeDtypeStruct((rows_p, v_p), jnp.float32),
                   jax.ShapeDtypeStruct((rows_p, 128), jnp.float32)),
        grid_spec=pltpu.PrefetchScalarGridSpec(
            num_scalar_prefetch=0,
            grid=grid,
            in_specs=[
                pl.BlockSpec((tm, d_model), x_map),
                pl.BlockSpec((d_model, tv), w_map),
                pl.BlockSpec((1, tv), b_map),
            ],
            out_specs=[
                pl.BlockSpec((tm, tv), lg_map),
                pl.BlockSpec((tm, 128), ls_map),
            ],
            scratch_shapes=[
                pltpu.VMEM((n_state, tm, 1), jnp.float32),
                pltpu.VMEM((n_state, tm, 1), jnp.float32),
            ],
        ),
        compiler_params=pltpu.CompilerParams(
            dimension_semantics=dims, vmem_limit_bytes=vmem_limit),
        cost_estimate=cost1,
    )(x_p, w_p, b_p)

    # Normalize: one lane-dense VPU subtract per tile; the logits buffer is
    # aliased to the output so no extra HBM allocation is needed.
    cost2 = pl.CostEstimate(
        flops=rows_p * v_p, transcendentals=0,
        bytes_accessed=2 * rows_p * v_p * 4 + rows_p * 128 * 4)

    out2d = pl.pallas_call(
        _normalize_kernel,
        out_shape=jax.ShapeDtypeStruct((rows_p, v_p), jnp.float32),
        grid_spec=pltpu.PrefetchScalarGridSpec(
            num_scalar_prefetch=0,
            grid=(nr, nv),
            in_specs=[
                pl.BlockSpec((tm, tv), lambda i, j: (i, j)),
                pl.BlockSpec((tm, 128), lambda i, j: (i, 0)),
            ],
            out_specs=pl.BlockSpec((tm, tv), lambda i, j: (i, j)),
        ),
        compiler_params=pltpu.CompilerParams(
            dimension_semantics=("parallel", "parallel"),
            vmem_limit_bytes=vmem_limit),
        cost_estimate=cost2,
        input_output_aliases={0: 0},
    )(logits_u, lse)

    out = out2d[:rows, :vocab]
    return out.reshape(*lead, vocab)


if __name__ == "__main__":
    # Small shapes consistent with the module: (batch, seq, d_model) -> vocab
    batch, seq, d_model, vocab = 2, 8, 32, 128

    key = jax.random.PRNGKey(0)
    kx, kw, kb = jax.random.split(key, 3)

    x = jax.random.normal(kx, (batch, seq, d_model), dtype=jnp.float32)
    # Deterministic "nn.Linear(d_model, vocab)" params in PyTorch layout.
    bound = 1.0 / math.sqrt(d_model)
    weight = jax.random.uniform(kw, (vocab, d_model), jnp.float32, -bound, bound)
    bias = jax.random.uniform(kb, (vocab,), jnp.float32, -bound, bound)

    # One-time parameter prep (transpose + pad + bf16 cast), then the forward.
    params = prepare_generator_params(weight, bias)
    out = generator_forward(x, params)
    out = jax.block_until_ready(out)
    assert out.shape == (batch, seq, vocab)
    assert out.dtype == jnp.float32

    # Reference matching the kernel's compute precision (bf16 matmul, f32 acc).
    logits_ref = jnp.dot(x.reshape(-1, d_model).astype(jnp.bfloat16),
                         weight.T.astype(jnp.bfloat16),
                         preferred_element_type=jnp.float32) + bias
    ref = jax.nn.log_softmax(logits_ref, axis=-1).reshape(batch, seq, vocab)
    assert jnp.allclose(out, ref, atol=1e-4, rtol=1e-4), \
        float(jnp.max(jnp.abs(out - ref)))

    # Loose check against the original pure-f32 module semantics.
    ref_f32 = jax.nn.log_softmax(x @ weight.T + bias, axis=-1)
    assert jnp.allclose(out, ref_f32, atol=5e-2, rtol=0.0), \
        float(jnp.max(jnp.abs(out - ref_f32)))

    print("KERNEL_OK")
</pallas_src>

<mosaic_0001>
module attributes {stable_mosaic.version = 11 : i64} {
  func.func @_logits_lse_kernel(%arg0: i32, %arg1: i32, %arg2: memref<16x32xbf16, #tpu.memory_space<vmem>>, %arg3: memref<32x128xbf16, #tpu.memory_space<vmem>>, %arg4: memref<1x128xf32, #tpu.memory_space<vmem>>, %arg5: memref<16x128xf32, #tpu.memory_space<vmem>>, %arg6: memref<16x128xf32, #tpu.memory_space<vmem>>, %arg7: memref<1x16x1xf32, #tpu.memory_space<vmem>>, %arg8: memref<1x16x1xf32, #tpu.memory_space<vmem>>) attributes {dimension_semantics = [#tpu.dimension_semantics<parallel>, #tpu.dimension_semantics<arbitrary>], iteration_bounds = array<i64: 1, 1>, scalar_prefetch = 0 : i64, scratch_operands = 2 : i64, tpu.core_type = #tpu.core_type<tc>, window_params = [{transform_indices = @transform_0, window_bounds = array<i64: 16, 32>}, {transform_indices = @transform_1, window_bounds = array<i64: 32, 128>}, {transform_indices = @transform_2, window_bounds = array<i64: 1, 128>}, {transform_indices = @transform_3, window_bounds = array<i64: 16, 128>}, {transform_indices = @transform_4, window_bounds = array<i64: 16, 128>}]} {
    %c0_i32 = arith.constant 0 : i32
    %0 = arith.cmpi eq, %arg1, %c0_i32 : i32
    %1 = arith.extui %0 : i1 to i32
    %c0_i32_0 = arith.constant 0 : i32
    %2 = arith.cmpi ne, %1, %c0_i32_0 : i32
    scf.if %2 {
      %cst_24 = arith.constant -1.000000e+30 : f32
      %35 = vector.broadcast %cst_24 : f32 to vector<16x1xf32>
      %c0_25 = arith.constant 0 : index
      %c0_26 = arith.constant 0 : index
      %c0_27 = arith.constant 0 : index
      %36 = vector.load %arg7[%c0_25, %c0_26, %c0_27] : memref<1x16x1xf32, #tpu.memory_space<vmem>>, vector<1x16x1xf32>
      %37 = vector.shape_cast %36 : vector<1x16x1xf32> to vector<16x1xf32>
      %38 = vector.shape_cast %35 : vector<16x1xf32> to vector<1x16x1xf32>
      tpu.vector_store %arg7[%c0_25, %c0_26, %c0_27], %38 {strides = array<i32>} : memref<1x16x1xf32, #tpu.memory_space<vmem>>, vector<1x16x1xf32>,
      %cst_28 = arith.constant 0.000000e+00 : f32
      %39 = vector.broadcast %cst_28 : f32 to vector<16x1xf32>
      %c0_29 = arith.constant 0 : index
      %c0_30 = arith.constant 0 : index
      %c0_31 = arith.constant 0 : index
      %40 = vector.load %arg8[%c0_29, %c0_30, %c0_31] : memref<1x16x1xf32, #tpu.memory_space<vmem>>, vector<1x16x1xf32>
      %41 = vector.shape_cast %40 : vector<1x16x1xf32> to vector<16x1xf32>
      %42 = vector.shape_cast %39 : vector<16x1xf32> to vector<1x16x1xf32>
      tpu.vector_store %arg8[%c0_29, %c0_30, %c0_31], %42 {strides = array<i32>} : memref<1x16x1xf32, #tpu.memory_space<vmem>>, vector<1x16x1xf32>,
    } else {
    }
    %c0 = arith.constant 0 : index
    %c0_1 = arith.constant 0 : index
    %3 = vector.load %arg2[%c0, %c0_1] : memref<16x32xbf16, #tpu.memory_space<vmem>>, vector<16x32xbf16>
    %c0_2 = arith.constant 0 : index
    %c0_3 = arith.constant 0 : index
    %4 = vector.load %arg3[%c0_2, %c0_3] : memref<32x128xbf16, #tpu.memory_space<vmem>>, vector<32x128xbf16>
    %cst = arith.constant dense<0.000000e+00> : vector<16x128xf32>
    %5 = tpu.matmul %3, %4, %cst {dimension_numbers = #tpu.dot_dimension_numbers<[1], [0], [0], [1], [0, 0, 1, 1], [], []>} : vector<16x32xbf16>, vector<32x128xbf16>, vector<16x128xf32> -> vector<16x128xf32>
    %c0_4 = arith.constant 0 : index
    %c0_5 = arith.constant 0 : index
    %6 = vector.load %arg4[%c0_4, %c0_5] : memref<1x128xf32, #tpu.memory_space<vmem>>, vector<1x128xf32>
    %7 = vector.broadcast %6 : vector<1x128xf32> to vector<16x128xf32>
    %8 = arith.addf %5, %7 : vector<16x128xf32>
    %c0_6 = arith.constant 0 : index
    %c0_7 = arith.constant 0 : index
    %9 = vector.load %arg5[%c0_6, %c0_7] : memref<16x128xf32, #tpu.memory_space<vmem>>, vector<16x128xf32>
    tpu.vector_store %arg5[%c0_6, %c0_7], %8 {strides = array<i32>} : memref<16x128xf32, #tpu.memory_space<vmem>>, vector<16x128xf32>,
    %c0_8 = arith.constant 0 : index
    %c0_9 = arith.constant 0 : index
    %c0_10 = arith.constant 0 : index
    %10 = vector.load %arg7[%c0_8, %c0_9, %c0_10] : memref<1x16x1xf32, #tpu.memory_space<vmem>>, vector<1x16x1xf32>
    %11 = vector.shape_cast %10 : vector<1x16x1xf32> to vector<16x1xf32>
    %cst_11 = arith.constant dense<0xFF800000> : vector<16xf32>
    %12 = vector.multi_reduction <maximumf>, %8, %cst_11 [1] : vector<16x128xf32> to vector<16xf32>
    %13 = vector.shape_cast %12 : vector<16xf32> to vector<16x1xf32>
    %14 = arith.maximumf %11, %13 : vector<16x1xf32>
    %c0_12 = arith.constant 0 : index
    %c0_13 = arith.constant 0 : index
    %c0_14 = arith.constant 0 : index
    %15 = vector.load %arg8[%c0_12, %c0_13, %c0_14] : memref<1x16x1xf32, #tpu.memory_space<vmem>>, vector<1x16x1xf32>
    %16 = vector.shape_cast %15 : vector<1x16x1xf32> to vector<16x1xf32>
    %17 = arith.subf %11, %14 : vector<16x1xf32>
    %18 = math.exp %17 : vector<16x1xf32>
    %19 = arith.mulf %16, %18 : vector<16x1xf32>
    %20 = vector.broadcast %14 : vector<16x1xf32> to vector<16x128xf32>
    %21 = arith.subf %8, %20 : vector<16x128xf32>
    %22 = math.exp %21 : vector<16x128xf32>
    %cst_15 = arith.constant dense<0.000000e+00> : vector<16xf32>
    %23 = vector.multi_reduction <add>, %22, %cst_15 [1] : vector<16x128xf32> to vector<16xf32>
    %24 = vector.shape_cast %23 : vector<16xf32> to vector<16x1xf32>
    %25 = arith.addf %19, %24 : vector<16x1xf32>
    %c0_16 = arith.constant 0 : index
    %c0_17 = arith.constant 0 : index
    %c0_18 = arith.constant 0 : index
    %26 = vector.load %arg7[%c0_16, %c0_17, %c0_18] : memref<1x16x1xf32, #tpu.memory_space<vmem>>, vector<1x16x1xf32>
    %27 = vector.shape_cast %26 : vector<1x16x1xf32> to vector<16x1xf32>
    %28 = vector.shape_cast %14 : vector<16x1xf32> to vector<1x16x1xf32>
    tpu.vector_store %arg7[%c0_16, %c0_17, %c0_18], %28 {strides = array<i32>} : memref<1x16x1xf32, #tpu.memory_space<vmem>>, vector<1x16x1xf32>,
    %c0_19 = arith.constant 0 : index
    %c0_20 = arith.constant 0 : index
    %c0_21 = arith.constant 0 : index
    %29 = vector.load %arg8[%c0_19, %c0_20, %c0_21] : memref<1x16x1xf32, #tpu.memory_space<vmem>>, vector<1x16x1xf32>
    %30 = vector.shape_cast %29 : vector<1x16x1xf32> to vector<16x1xf32>
    %31 = vector.shape_cast %25 : vector<16x1xf32> to vector<1x16x1xf32>
    tpu.vector_store %arg8[%c0_19, %c0_20, %c0_21], %31 {strides = array<i32>} : memref<1x16x1xf32, #tpu.memory_space<vmem>>, vector<1x16x1xf32>,
    %c0_i32_22 = arith.constant 0 : i32
    %32 = arith.cmpi eq, %arg1, %c0_i32_22 : i32
    %33 = arith.extui %32 : i1 to i32
    %c0_i32_23 = arith.constant 0 : i32
    %34 = arith.cmpi ne, %33, %c0_i32_23 : i32
    scf.if %34 {
      %35 = math.log %25 : vector<16x1xf32>
      %36 = arith.addf %14, %35 : vector<16x1xf32>
      %37 = vector.shape_cast %36 : vector<16x1xf32> to vector<16x1xf32>
      %38 = vector.broadcast %37 : vector<16x1xf32> to vector<16x128xf32>
      %c0_24 = arith.constant 0 : index
      %c0_25 = arith.constant 0 : index
      %39 = vector.load %arg6[%c0_24, %c0_25] : memref<16x128xf32, #tpu.memory_space<vmem>>, vector<16x128xf32>
      tpu.vector_store %arg6[%c0_24, %c0_25], %38 {strides = array<i32>} : memref<16x128xf32, #tpu.memory_space<vmem>>, vector<16x128xf32>,
    } else {
    }
    return
  }
  func.func @transform_0(%arg0: i32, %arg1: i32) -> (i32, i32) {
    %c0_i32 = arith.constant 0 : i32
    %c0_i32_0 = arith.constant 0 : i32
    return %arg0, %c0_i32 : i32, i32
  }
  func.func @transform_1(%arg0: i32, %arg1: i32) -> (i32, i32) {
    %c0_i32 = arith.constant 0 : i32
    %c0_i32_0 = arith.constant 0 : i32
    return %c0_i32, %arg1 : i32, i32
  }
  func.func @transform_2(%arg0: i32, %arg1: i32) -> (i32, i32) {
    %c0_i32 = arith.constant 0 : i32
    %c0_i32_0 = arith.constant 0 : i32
    return %c0_i32, %arg1 : i32, i32
  }
  func.func @transform_3(%arg0: i32, %arg1: i32) -> (i32, i32) {
    %c0_i32 = arith.constant 0 : i32
    return %arg0, %arg1 : i32, i32
  }
  func.func @transform_4(%arg0: i32, %arg1: i32) -> (i32, i32) {
    %c0_i32 = arith.constant 0 : i32
    %c0_i32_0 = arith.constant 0 : i32
    return %arg0, %c0_i32 : i32, i32
  }
}

</mosaic_0001>

<bundles_post_ra>
// kernel: tpu_custom_call.1
= control target key start
LH: loop header
LB: loop body
LE: loop exit
PB: predicated region body
PF: predicated region fallthrough
CT: control target
= control target key end

     0   :  { %10 = vsyncpa [#allocation5], 0  ;;  %s521_s0 = inlined_call_operand.hbm [shape: bf16[16,32], index: 0, kind: input, shape index: {}]   ;;  %s522_s1 = inlined_call_operand.hbm [shape: bf16[32,128], index: 1, kind: input, shape index: {}]   ;;  %s523_s2 = inlined_call_operand.hbm [shape: f32[1,128], index: 2, kind: input, shape index: {}]   ;;  %s524_s3 = inlined_call_operand.hbm [shape: f32[16,128], index: 3, kind: output, shape index: {0}]   ;;  %s525_s4 = inlined_call_operand.hbm [shape: f32[16,128], index: 4, kind: output, shape index: {1}]  }
   0x1   :  { %11 = vsyncpa [#allocation8], 0 }
   0x2   :  { %12 = vsyncpa [#allocation6], 0 }
   0x3   :  { %13 = vsyncpa [#allocation12], 0  ;;  %s408_s15 = smov [#allocation7]   ;;  %s409_s17 = smov [#allocation4]  }
   0x4   :  { %s31_s16 = sshll.u32 %s408_s15, 4  ;;  %s19_s18 = sshll.u32 %s409_s17, 4  ;;  %s32_s16 = int_to_ptr.vmem [resolvable:$true] %s31_s16  ;;  %s446_s18 = int_to_ptr.vmem [resolvable:$true] %s19_s18 }
   0x5   :  { %s290_s21 = scalar_lea.hbm %s522_s1, 256 }
   0x6   :  { %p291_p0 = scmp.ne.s32.totalorder %s522_s1, %s290_s21  ;;  %p294_p1 = scmp.lt.u32.totalorder %s290_s21, %s522_s1 }
   0x8   :  { %p296_p2 = pnand %p294_p1, %p291_p0 }
   0xa   :  { %299 = shalt.err (!%p296_p2)
}
   0xb   :  { %s300_s26 = scalar_lea.vmem %s32_s16, 256  ;;  %p305_p4 = scmp.lt.s32.totalorder %s32_s16, %s32_s16 }
   0xc   :  { %p301_p3 = scmp.ne.s32.totalorder %s32_s16, %s300_s26  ;;  %p306_p5 = scmp.lt.s32.totalorder %s300_s26, %s300_s26 }
   0xe   :  { %p307_p6 = por %p306_p5, %p305_p4 }
  0x10   :  { %p308_p7 = pnand %p307_p6, %p301_p3 }
  0x12   :  { %311 = shalt.err (!%p308_p7)
}
  0x13   :  { %s410_s27 = smov 64   ;;  %s411_s28 = smov 4  }
  0x14   :  { %37 = dma.hbm_to_vmem [thread:$0]  %s522_s1, 256, %s32_s16, [#allocation8], %s410_s27, %s410_s27, %s411_s28  }
  0x15   :  { %s312_s7 = scalar_lea.hbm %s521_s0, 128 }
  0x16   :  { %p313_p8 = scmp.ne.s32.totalorder %s521_s0, %s312_s7  ;;  %p316_p9 = scmp.lt.u32.totalorder %s312_s7, %s521_s0 }
  0x18   :  { %p318_p10 = pnand %p316_p9, %p313_p8 }
  0x1a   :  { %321 = shalt.err (!%p318_p10)
}
  0x1b   :  { %s322_s12 = scalar_lea.vmem %s446_s18, 128  ;;  %p327_p12 = scmp.lt.s32.totalorder %s446_s18, %s446_s18 }
  0x1c   :  { %p323_p11 = scmp.ne.s32.totalorder %s446_s18, %s322_s12  ;;  %p328_p13 = scmp.lt.s32.totalorder %s322_s12, %s322_s12 }
  0x1e   :  { %p329_p0 = por %p328_p13, %p327_p12 }
  0x20   :  { %p330_p1 = pnand %p329_p0, %p323_p11 }
  0x22   :  { %333 = shalt.err (!%p330_p1)
}
  0x23   :  { %25 = dma.hbm_to_vmem [thread:$0]  %s521_s0, 128, %s446_s18, [#allocation5], %s410_s27, %s410_s27, %s411_s28  }
  0x24   :  { %s412_s14 = smov [#allocation9]   ;;  %s334_s19 = scalar_lea.hbm %s523_s2, 16 }
  0x25   :  { %s44_s15 = sshll.u32 %s412_s14, 4  ;;  %p335_p2 = scmp.ne.s32.totalorder %s523_s2, %s334_s19  ;;  %s45_s15 = int_to_ptr.vmem [resolvable:$true] %s44_s15 }
  0x26   :  { %p338_p3 = scmp.lt.u32.totalorder %s334_s19, %s523_s2 }
  0x28   :  { %p340_p4 = pnand %p338_p3, %p335_p2 }
  0x2a   :  { %343 = shalt.err (!%p340_p4)
}
  0x2b   :  { %s344_s24 = scalar_lea.vmem %s45_s15, 16  ;;  %s348_s0 = scalar_lea.vmem %s45_s15, 32 }
  0x2c   :  { %p345_p5 = scmp.ne.s32.totalorder %s45_s15, %s344_s24  ;;  %p349_p6 = scmp.lt.s32.totalorder %s45_s15, %s45_s15 }
  0x2d   :  { %p350_p7 = scmp.lt.s32.totalorder %s348_s0, %s344_s24 }
  0x2f   :  { %p351_p8 = por %p350_p7, %p349_p6 }
  0x31   :  { %p352_p9 = pnand %p351_p8, %p345_p5 }
  0x33   :  { %355 = shalt.err (!%p352_p9)
}
  0x34   :  { %47 = dma.hbm_to_vmem [thread:$0]  %s523_s2, 16, %s45_s15, [#allocation8]  }
  0x35   :  { %400 = dma.done.wait [#allocation5], 128  }
  0x36   :  { %401 = vsyncadd [#allocation5], 4294967168 }
  0x37   :  { %402 = dma.done.wait [#allocation8], 272  }
  0x38   :  { %403 = vsyncadd [#allocation8], 4294967024  ;;  %vm62_vm0 = vcmask 7168   ;;  %v413_v0 = vmov 0.0   ;;  %vm414_vm1 = vmmov 0   ;;  %v275_v1 = vld [vmem:[#allocation7] sm:$0xff]  }
  0x39   :  { %65 = vst.msk [vmem:[#allocation3] sm:$0xff] %vm62_vm0, %v413_v0  ;;  %66 = vst.msk [vmem:[#allocation3 + $0x8] sm:$0xff] %vm62_vm0, %v413_v0  ;;  %252 = vmatprep.subr.bf16.mxu0 %v413_v0  ;;  %256 = vmatprep.mubr.msk.bf16.mxu0 %vm414_vm1, %v413_v0  ;;  %v276_v2 = vld [vmem:[#allocation7 + $0x8] sm:$0xff]   ;;  %v277_v3 = vld [vmem:[#allocation4] sm:$0xff]   ;;  %vm97_vm2 = vcmask 261120   ;;  %v416_v12 = vmov 0  }
  0x3a   :  { %253 = vmatpush3.bf16.msra.mxu0 %v275_v1  ;;  %v415_v4 = vmov -1e+30   ;;  %v244_v5 = vld [vmem:[#allocation9] ss:$0 sm:$0xff]  ;;  %273 = vset.pattern.permute.xlu1 %v416_v12  ;;  %s417_s2 = smov [#allocation10]  }
  0x3b   :  { %254 = vmatprep.subr.bf16.mxu0 %v413_v0  ;;  %63 = vst.msk [vmem:[#allocation2] sm:$0xff] %vm62_vm0, %v415_v4  ;;  %64 = vst.msk [vmem:[#allocation2 + $0x8] sm:$0xff] %vm62_vm0, %v415_v4  ;;  %274 = vset.pattern.permute.xlu0 %v416_v12  ;;  %s215_s26 = sshll.u32 %s417_s2, 4  ;;  %s216_s26 = int_to_ptr.vmem [resolvable:$true] %s215_s26 }
  0x3c   :  { %s356_s27 = scalar_lea.vmem %s216_s26, 256  ;;  %p361_p11 = scmp.lt.s32.totalorder %s216_s26, %s216_s26 }
  0x3d   :  { %p357_p10 = scmp.ne.s32.totalorder %s216_s26, %s356_s27  ;;  %p362_p12 = scmp.lt.s32.totalorder %s356_s27, %s356_s27 }
  0x3e   :  { %255 = vmatpush3.bf16.msra.mxu0 %v276_v2 }
  0x3f   :  { %p363_p13 = por %p362_p12, %p361_p11 }
  0x40   :  { %v152_v32 = vld [vmem:[#allocation3] sm:$0xff]  ;;  %v153_v36 = vld [vmem:[#allocation3 + $0x8] sm:$0xff] }
  0x41   :  { %257 = vmatmul.mubr.msk.bf16.vlgmr.msra.gmra.mrb[0].mxu0 %vm97_vm2, %v277_v3  ;;  %p364_p0 = pnand %p363_p13, %p357_p10 }
  0x42   :  { %v144_v13 = vld [vmem:[#allocation2] sm:$0xff]  ;;  %v145_v16 = vld [vmem:[#allocation2 + $0x8] sm:$0xff] }
 0x114   :  { %v135_v6 = vpop.f32.mrb[0].mxu0 }
 0x115   :  { %v136_v7 = vadd.f32 %v244_v5, %v135_v6  ;;  %v258_v8 = vpop.f32.mrb[1].mxu0 }
 0x116   :  { %v138_v9 = vpop.f32.mrb[2].mxu0 }
 0x117   :  { %142 = vst [vmem:[#allocation10] sm:$0xff] %v136_v7  ;;  %v139_v10 = vadd.f32 %v244_v5, %v138_v9  ;;  %146 = vmax.xlane.f32.xlu0 %v136_v7  ;;  %v259_v11 = vpop.f32.mrb[3].mxu0 }
 0x119   :  { %143 = vst [vmem:[#allocation10 + $0x8] sm:$0xff] %v139_v10 }
 0x11b   :  { %148 = vmax.xlane.f32.xlu0 %v139_v10 }
 0x1a4   :  { %v147_v14 = vpop.xlane.xlu0 %146 }
 0x1a5   :  { %v150_v15 = vmax.f32 %v144_v13, %v147_v14 }
 0x1a7   :  { %185 = vst.msk [vmem:[#allocation2] sm:$0xff] %vm62_vm0, %v150_v15  ;;  %164 = vperm.xlu1 %273, %v150_v15   ;;  %v154_v27 = vsub.f32 %v144_v13, %v150_v15 }
 0x1a8   :  { %v149_v17 = vpop.xlane.xlu0 %148 }
 0x1a9   :  { %v151_v18 = vmax.f32 %v145_v16, %v149_v17  ;;  %v156_v28 = vmul.f32 1.442695, %v154_v27 }
 0x1ab   :  { %186 = vst.msk [vmem:[#allocation2 + $0x8] sm:$0xff] %vm62_vm0, %v151_v18  ;;  %169 = vperm.xlu1 %273, %v151_v18   ;;  %v155_v29 = vsub.f32 %v145_v16, %v151_v18 }
 0x1ad   :  { %v158_v30 = vmul.f32 1.442695, %v155_v29 }
 0x226   :  { %v165_v19 = vpop.permute.xlu1 %164 }
 0x227   :  { %v172_v20 = vsub.f32 %v136_v7, %v165_v19 }
 0x229   :  { %v174_v21 = vmul.f32 1.442695, %v172_v20 }
 0x22a   :  { %v170_v22 = vpop.permute.xlu1 %169 }
 0x22b   :  { %278 = vpow2.f32 %v174_v21  ;;  %v173_v23 = vsub.f32 %v139_v10, %v170_v22 }
 0x22d   :  { %v176_v24 = vmul.f32 1.442695, %v173_v23 }
 0x22f   :  { %280 = vpow2.f32 %v176_v24 }
 0x230   :  { %282 = vpow2.f32 %v156_v28 }
 0x231   :  { %284 = vpow2.f32 %v158_v30 }
 0x235   :  { %v279_v25 = vpop.eup %278 }
 0x236   :  { %178 = vadd.xlane.f32.xlu0 %v279_v25 }
 0x239   :  { %v281_v26 = vpop.eup %280 }
 0x23a   :  { %180 = vadd.xlane.f32.xlu1 %v281_v26  ;;  %v283_v31 = vpop.eup %282 }
 0x23b   :  { %v160_v33 = vmul.f32 %v283_v31, %v152_v32  ;;  %v285_v34 = vpop.eup %284 }
 0x23c   :  { %v161_v38 = vmul.f32 %v285_v34, %v153_v36 }
 0x2c3   :  { %v179_v35 = vpop.xlane.xlu0 %178 }
 0x2c4   :  { %v182_v37 = vadd.f32 %v179_v35, %v160_v33 }
 0x2c6   :  { %187 = vst.msk [vmem:[#allocation3] sm:$0xff] %vm62_vm0, %v182_v37  ;;  %286 = vlog2.f32 %v182_v37 }
 0x2c7   :  { %v181_v39 = vpop.xlane.xlu1 %180 }
 0x2c8   :  { %v183_v40 = vadd.f32 %v181_v39, %v161_v38 }
 0x2ca   :  { %188 = vst.msk [vmem:[#allocation3 + $0x8] sm:$0xff] %vm62_vm0, %v183_v40  ;;  %288 = vlog2.f32 %v183_v40 }
 0x2d0   :  { %v287_v41 = vpop.eup %286 }
 0x2d1   :  { %v193_v42 = vmul.f32 0.6931472, %v287_v41 }
 0x2d3   :  { %v196_v43 = vadd.f32 %v193_v42, %v150_v15 }
 0x2d4   :  { %v289_v44 = vpop.eup %288 }
 0x2d5   :  { %v195_v45 = vmul.f32 0.6931472, %v289_v44  ;;  %200 = vperm.xlu0 %274, %v196_v43  }
 0x2d7   :  { %v197_v46 = vadd.f32 %v195_v45, %v151_v18 }
 0x2d9   :  { %205 = vperm.xlu1 %273, %v197_v46  }
 0x2da   :  { %367 = shalt.err (!%p364_p0)
}
 0x2db   :  { %s368_s30 = scalar_lea.hbm %s524_s3, 256 }
 0x2dc   :  { %p369_p1 = scmp.ne.s32.totalorder %s524_s3, %s368_s30  ;;  %p372_p2 = scmp.lt.u32.totalorder %s368_s30, %s524_s3 }
 0x2de   :  { %p374_p3 = pnand %p372_p2, %p369_p1 }
 0x2e0   :  { %377 = shalt.err (!%p374_p3)
}
 0x2e1   :  { %s418_s9 = smov 128   ;;  %s419_s10 = smov 8  }
 0x2e2   :  { %221 = dma.vmem_to_hbm [thread:$0]  %s216_s26, 256, %s524_s3, [#allocation6], %s418_s9, %s418_s9, %s419_s10  }
 0x2e3   :  { %s420_s1 = smov [#allocation11]  }
 0x2e4   :  { %s227_s13 = sshll.u32 %s420_s1, 4  ;;  %s228_s13 = int_to_ptr.vmem [resolvable:$true] %s227_s13 }
 0x2e5   :  { %s378_s14 = scalar_lea.vmem %s228_s13, 256  ;;  %p383_p5 = scmp.lt.s32.totalorder %s228_s13, %s228_s13 }
 0x2e6   :  { %p379_p4 = scmp.ne.s32.totalorder %s228_s13, %s378_s14  ;;  %p384_p6 = scmp.lt.s32.totalorder %s378_s14, %s378_s14 }
 0x2e8   :  { %p385_p7 = por %p384_p6, %p383_p5 }
 0x2ea   :  { %p386_p8 = pnand %p385_p7, %p379_p4 }
 0x354   :  { %v201_v47 = vpop.permute.xlu0 %200 }
 0x355   :  { %208 = vst [vmem:[#allocation11] sm:$0xff] %v201_v47 }
 0x358   :  { %v206_v48 = vpop.permute.xlu1 %205 }
 0x359   :  { %209 = vst [vmem:[#allocation11 + $0x8] sm:$0xff] %v206_v48 }
 0x35a   :  { %389 = shalt.err (!%p386_p8)
}
 0x35b   :  { %s390_s17 = scalar_lea.hbm %s525_s4, 256 }
 0x35c   :  { %p391_p9 = scmp.ne.s32.totalorder %s525_s4, %s390_s17  ;;  %p394_p10 = scmp.lt.u32.totalorder %s390_s17, %s525_s4 }
 0x35e   :  { %p396_p11 = pnand %p394_p10, %p391_p9 }
 0x360   :  { %399 = shalt.err (!%p396_p11)
}
 0x361   :  { %233 = dma.vmem_to_hbm [thread:$0]  %s228_s13, 256, %s525_s4, [#allocation12], %s418_s9, %s418_s9, %s419_s10  }
 0x362   :  { %404 = dma.done.wait [#allocation6], 256  }
 0x363   :  { %405 = vsyncadd [#allocation6], 4294967040 }
 0x364   :  { %406 = dma.done.wait [#allocation12], 256  }
 0x365   :  { %407 = vsyncadd [#allocation12], 4294967040 }
 0x366   :  { %240 = vsyncpa [#allocation5], 1 }
 0x367   :  { %241 = vsyncpa [#allocation8], 1 }
 0x368   :  { %242 = vsyncpa [#allocation6], 1 }
 0x369   :  { %243 = vsyncpa [#allocation12], 1 }

</bundles_post_ra>
